<compile_context>
chip_gen: v7x
topology: tpu7x:2x2x1
jax: 0.10.0
libtpu: 0.0.40
codegen_flags: <defaults>
</compile_context>

<pallas_src>
import math

import jax
import jax.numpy as jnp
from jax.experimental import pallas as pl
from jax.experimental.pallas import tpu as pltpu


def _rmse_kernel(yhat_ref, y_ref, rmse_ref):
    """Per-tile row-wise RMSE.

    yhat_ref, y_ref : (TB, D) VMEM tiles, native input dtype
    rmse_ref        : (TB, 1) per-row RMSE output tile, f32
    """
    # Cast AFTER the load so sub-32-bit inputs stream at native width.
    yhat = yhat_ref[...].astype(jnp.float32)
    y = y_ref[...].astype(jnp.float32)
    diff = yhat - y
    mse = jnp.mean(diff * diff, axis=-1, keepdims=True)   # (TB, 1)
    rmse_ref[...] = jnp.sqrt(mse)


def _choose_block_rows(rows, d, itemsize, vmem_budget_bytes=8 * 1024 * 1024):
    """Pick a batch tile so 2 inputs x 2 double-buffers fit under the budget.

    The 8 MiB budget (total for input double-buffering) stays inside v5e's
    16 MiB default scoped VMEM and leaves headroom on v6e/v7x.
    """
    if rows <= 8:
        return max(rows, 1)
    tb = vmem_budget_bytes // (4 * d * itemsize)   # 2 inputs * 2 buffers
    return max(8, min(tb, 8192))


def rmse_loss(yhat, y, reduction="mean", *, block_rows=None):
    """Pallas RMSELoss.forward.

    Returns (result, rmse_per_row) where `result` matches the PyTorch module's
    return value for the given reduction and `rmse_per_row` mirrors self.rmse.
    """
    if yhat.shape != y.shape:
        raise ValueError(f"shape mismatch: {yhat.shape} vs {y.shape}")
    if reduction not in ("mean", "none"):
        raise ValueError(f"unsupported reduction: {reduction!r}")

    orig_ndim = yhat.ndim
    if orig_ndim == 1:
        yhat = yhat[None, :]
        y = y[None, :]

    *lead, d = yhat.shape
    rows = math.prod(lead) if lead else 1
    yhat2 = yhat.reshape(rows, d)
    y2 = y.reshape(rows, d)

    itemsize = jnp.dtype(yhat2.dtype).itemsize
    tb = int(block_rows) if block_rows is not None else _choose_block_rows(
        rows, d, itemsize)

    # Align / clamp so blocks never exceed the array along the sublane axis;
    # ragged tails are handled by Pallas' partial-edge-block masking.
    if rows < 8:
        tb = rows
    else:
        tb = max(8, (tb // 8) * 8)
        tb = min(tb, (rows // 8) * 8)

    grid = (pl.cdiv(rows, tb),)

    rmse_2d = pl.pallas_call(
        _rmse_kernel,
        out_shape=jax.ShapeDtypeStruct((rows, 1), jnp.float32),
        grid_spec=pltpu.PrefetchScalarGridSpec(
            num_scalar_prefetch=0,
            grid=grid,
            in_specs=[
                pl.BlockSpec((tb, d), lambda i: (i, 0)),
                pl.BlockSpec((tb, d), lambda i: (i, 0)),
            ],
            out_specs=pl.BlockSpec((tb, 1), lambda i: (i, 0)),
        ),
        compiler_params=pltpu.CompilerParams(
            # No cross-iteration state -> megacore-shardable on v7x.
            dimension_semantics=("parallel",),
        ),
    )(yhat2, y2)

    rmse = rmse_2d[:, 0]
    if orig_ndim == 1:
        rmse = rmse.reshape(())
    else:
        rmse = rmse.reshape(tuple(lead))

    if reduction == "none":
        return rmse, rmse
    # reduction == "mean": tiny reduction over B floats, done in XLA.
    return jnp.mean(rmse), rmse


if __name__ == "__main__":
    key = jax.random.PRNGKey(0)
    k1, k2, k3, k4 = jax.random.split(key, 4)

    # --- small test matching the module's typical (batch, features) use ---
    B, D = 16, 32
    yhat = jax.random.normal(k1, (B, D), dtype=jnp.float32)
    y = jax.random.normal(k2, (B, D), dtype=jnp.float32)

    out_mean, rmse = rmse_loss(yhat, y, reduction="mean")
    jax.block_until_ready((out_mean, rmse))

    se_ref = (yhat - y) ** 2
    rmse_ref = jnp.sqrt(jnp.mean(se_ref, axis=-1))
    mean_ref = jnp.mean(rmse_ref)
    assert jnp.allclose(rmse, rmse_ref, rtol=1e-5, atol=1e-6)
    assert jnp.allclose(out_mean, mean_ref, rtol=1e-5, atol=1e-6)

    out_none, _ = rmse_loss(yhat, y, reduction="none")
    jax.block_until_ready(out_none)
    assert jnp.allclose(out_none, rmse_ref, rtol=1e-5, atol=1e-6)

    # --- multi-tile grid + ragged batch (partial last block), small tile ---
    B2, D2 = 250, 128
    yhat2 = jax.random.normal(k3, (B2, D2), dtype=jnp.float32)
    y2 = jax.random.normal(k4, (B2, D2), dtype=jnp.float32)
    rmse2_ref = jnp.sqrt(jnp.mean((yhat2 - y2) ** 2, axis=-1))

    out2, rmse2 = rmse_loss(yhat2, y2, reduction="mean", block_rows=64)
    jax.block_until_ready((out2, rmse2))
    assert jnp.allclose(rmse2, rmse2_ref, rtol=1e-5, atol=1e-6)
    assert jnp.allclose(out2, jnp.mean(rmse2_ref), rtol=1e-5, atol=1e-6)

    # Same shapes with the default tile heuristic (different ragged tail).
    out2b, rmse2b = rmse_loss(yhat2, y2, reduction="mean")
    jax.block_until_ready((out2b, rmse2b))
    assert jnp.allclose(rmse2b, rmse2_ref, rtol=1e-5, atol=1e-6)
    assert jnp.allclose(out2b, jnp.mean(rmse2_ref), rtol=1e-5, atol=1e-6)

    # --- bf16 inputs stream at native width, computed in f32 inside kernel ---
    yhat_bf = yhat.astype(jnp.bfloat16)
    y_bf = y.astype(jnp.bfloat16)
    out_bf, rmse_bf = rmse_loss(yhat_bf, y_bf, reduction="mean")
    jax.block_until_ready((out_bf, rmse_bf))
    diff_bf = yhat_bf.astype(jnp.float32) - y_bf.astype(jnp.float32)
    rmse_bf_ref = jnp.sqrt(jnp.mean(diff_bf * diff_bf, axis=-1))
    assert jnp.allclose(rmse_bf, rmse_bf_ref, rtol=1e-5, atol=1e-6)
    assert jnp.allclose(out_bf, jnp.mean(rmse_bf_ref), rtol=1e-5, atol=1e-6)

    print("KERNEL_OK")
</pallas_src>

<mosaic_0001>
module attributes {stable_mosaic.version = 11 : i64} {
  func.func @_rmse_kernel(%arg0: i32, %arg1: memref<16x32xf32, #tpu.memory_space<vmem>>, %arg2: memref<16x32xf32, #tpu.memory_space<vmem>>, %arg3: memref<16x1xf32, #tpu.memory_space<vmem>>) attributes {dimension_semantics = [#tpu.dimension_semantics<parallel>], iteration_bounds = array<i64: 1>, scalar_prefetch = 0 : i64, scratch_operands = 0 : i64, tpu.core_type = #tpu.core_type<tc>, window_params = [{transform_indices = @transform_0, window_bounds = array<i64: 16, 32>}, {transform_indices = @transform_1, window_bounds = array<i64: 16, 32>}, {transform_indices = @transform_2, window_bounds = array<i64: 16, 1>}]} {
    %c0 = arith.constant 0 : index
    %c0_0 = arith.constant 0 : index
    %0 = vector.load %arg1[%c0, %c0_0] : memref<16x32xf32, #tpu.memory_space<vmem>>, vector<16x32xf32>
    %c0_1 = arith.constant 0 : index
    %c0_2 = arith.constant 0 : index
    %1 = vector.load %arg2[%c0_1, %c0_2] : memref<16x32xf32, #tpu.memory_space<vmem>>, vector<16x32xf32>
    %2 = arith.subf %0, %1 : vector<16x32xf32>
    %3 = arith.mulf %2, %2 : vector<16x32xf32>
    %cst = arith.constant dense<0.000000e+00> : vector<16xf32>
    %4 = vector.multi_reduction <add>, %3, %cst [1] : vector<16x32xf32> to vector<16xf32>
    %5 = vector.shape_cast %4 : vector<16xf32> to vector<16x1xf32>
    %cst_3 = arith.constant 3.200000e+01 : f32
    %6 = vector.broadcast %cst_3 : f32 to vector<16x1xf32>
    %7 = arith.divf %5, %6 : vector<16x1xf32>
    %8 = math.sqrt %7 : vector<16x1xf32>
    %c0_4 = arith.constant 0 : index
    %c0_5 = arith.constant 0 : index
    %9 = vector.load %arg3[%c0_4, %c0_5] : memref<16x1xf32, #tpu.memory_space<vmem>>, vector<16x1xf32>
    tpu.vector_store %arg3[%c0_4, %c0_5], %8 {strides = array<i32>} : memref<16x1xf32, #tpu.memory_space<vmem>>, vector<16x1xf32>,
    return
  }
  func.func @transform_0(%arg0: i32) -> (i32, i32) {
    %c0_i32 = arith.constant 0 : i32
    %c0_i32_0 = arith.constant 0 : i32
    return %arg0, %c0_i32 : i32, i32
  }
  func.func @transform_1(%arg0: i32) -> (i32, i32) {
    %c0_i32 = arith.constant 0 : i32
    %c0_i32_0 = arith.constant 0 : i32
    return %arg0, %c0_i32 : i32, i32
  }
  func.func @transform_2(%arg0: i32) -> (i32, i32) {
    %c0_i32 = arith.constant 0 : i32
    %c0_i32_0 = arith.constant 0 : i32
    return %arg0, %c0_i32 : i32, i32
  }
}

</mosaic_0001>

<bundles_post_ra>
// kernel: tpu_custom_call.1
= control target key start
LH: loop header
LB: loop body
LE: loop exit
PB: predicated region body
PF: predicated region fallthrough
CT: control target
= control target key end

     0   :  { %7 = vsyncpa [#allocation3], 0  ;;  %s185_s0 = inlined_call_operand.hbm [shape: f32[16,32], index: 0, kind: input, shape index: {}]   ;;  %s186_s1 = inlined_call_operand.hbm [shape: f32[16,32], index: 1, kind: input, shape index: {}]   ;;  %s187_s2 = inlined_call_operand.vmem [shape: f32[16,1], index: 2, kind: output, shape index: {}]  }
   0x1   :  { %8 = vsyncpa [#allocation5], 0  ;;  %s136_s9 = smov [#allocation2]   ;;  %s88_s13 = scalar_lea.hbm %s185_s0, 256 }
   0x2   :  { %s14_s10 = sshll.u32 %s136_s9, 4  ;;  %p89_p0 = scmp.ne.s32.totalorder %s185_s0, %s88_s13  ;;  %s15_s10 = int_to_ptr.vmem [resolvable:$true] %s14_s10 }
   0x3   :  { %p92_p1 = scmp.lt.u32.totalorder %s88_s13, %s185_s0 }
   0x5   :  { %p94_p2 = pnand %p92_p1, %p89_p0 }
   0x7   :  { %97 = shalt.err (!%p94_p2)
}
   0x8   :  { %s98_s18 = scalar_lea.vmem %s15_s10, 256  ;;  %p103_p4 = scmp.lt.s32.totalorder %s15_s10, %s15_s10 }
   0x9   :  { %p99_p3 = scmp.ne.s32.totalorder %s15_s10, %s98_s18  ;;  %p104_p5 = scmp.lt.s32.totalorder %s98_s18, %s98_s18 }
   0xb   :  { %p105_p6 = por %p104_p5, %p103_p4 }
   0xd   :  { %p106_p7 = pnand %p105_p6, %p99_p3 }
   0xf   :  { %109 = shalt.err (!%p106_p7)
}
  0x10   :  { %s137_s19 = smov 128   ;;  %s138_s20 = smov 8  }
  0x11   :  { %20 = dma.hbm_to_vmem [thread:$0]  %s185_s0, 256, %s15_s10, [#allocation3], %s137_s19, %s137_s19, %s138_s20  }
  0x12   :  { %s139_s23 = smov [#allocation4]   ;;  %s110_s27 = scalar_lea.hbm %s186_s1, 256 }
  0x13   :  { %s26_s24 = sshll.u32 %s139_s23, 4  ;;  %p111_p8 = scmp.ne.s32.totalorder %s186_s1, %s110_s27  ;;  %s27_s24 = int_to_ptr.vmem [resolvable:$true] %s26_s24 }
  0x14   :  { %p114_p9 = scmp.lt.u32.totalorder %s110_s27, %s186_s1 }
  0x16   :  { %p116_p10 = pnand %p114_p9, %p111_p8 }
  0x18   :  { %119 = shalt.err (!%p116_p10)
}
  0x19   :  { %s120_s4 = scalar_lea.vmem %s27_s24, 256  ;;  %p125_p12 = scmp.lt.s32.totalorder %s27_s24, %s27_s24 }
  0x1a   :  { %p121_p11 = scmp.ne.s32.totalorder %s27_s24, %s120_s4  ;;  %p126_p13 = scmp.lt.s32.totalorder %s120_s4, %s120_s4 }
  0x1c   :  { %p127_p0 = por %p126_p13, %p125_p12 }
  0x1e   :  { %p128_p1 = pnand %p127_p0, %p121_p11 }
  0x20   :  { %131 = shalt.err (!%p128_p1)
}
  0x21   :  { %32 = dma.hbm_to_vmem [thread:$0]  %s186_s1, 256, %s27_s24, [#allocation5], %s137_s19, %s137_s19, %s138_s20  }
  0x22   :  { %132 = dma.done.wait [#allocation3], 256  }
  0x23   :  { %133 = vsyncadd [#allocation3], 4294967040 }
  0x24   :  { %134 = dma.done.wait [#allocation5], 256  }
  0x25   :  { %135 = vsyncadd [#allocation5], 4294967040  ;;  %v39_v0 = vld [vmem:[#allocation2] sm:$0xff]  ;;  %v41_v1 = vld [vmem:[#allocation4] sm:$0xff]  ;;  %vm47_vm0 = vcmask 261120   ;;  %vm71_vm1 = vcmask 7168  }
  0x26   :  { %v40_v2 = vld [vmem:[#allocation2 + $0x8] sm:$0xff]  ;;  %v43_v3 = vsub.f32 %v39_v0, %v41_v1  ;;  %v42_v4 = vld [vmem:[#allocation4 + $0x8] sm:$0xff] }
  0x27   :  { %v44_v5 = vsub.f32 %v40_v2, %v42_v4 }
  0x28   :  { %v45_v6 = vmul.f32 %v43_v3, %v43_v3 }
  0x29   :  { %v46_v7 = vmul.f32 %v44_v5, %v44_v5 }
  0x2a   :  { %v48_v8 = vsel %vm47_vm0, %v45_v6, 0.0 }
  0x2b   :  { %49 = vadd.xlane.f32.xlu0 %v48_v8  ;;  %v51_v9 = vsel %vm47_vm0, %v46_v7, 0.0 }
  0x2f   :  { %52 = vadd.xlane.f32.xlu0 %v51_v9 }
  0xb8   :  { %v50_v10 = vpop.xlane.xlu0 %49 }
  0xb9   :  { %v55_v11 = vmul.f32 0.03125, %v50_v10 }
  0xbb   :  { %84 = vrsqrt.f32 %v55_v11  ;;  %vm59_vm2 = vcmp.eq.f32.partialorder %v55_v11, inf  ;;  %v62_v16 = vand.u32 2147483648, %v55_v11  ;;  %vm61_vm3 = vcmp.eq.f32.partialorder %v55_v11, 0.0 }
  0xbc   :  { %v53_v12 = vpop.xlane.xlu0 %52 }
  0xbd   :  { %v56_v13 = vmul.f32 0.03125, %v53_v12 }
  0xbf   :  { %86 = vrsqrt.f32 %v56_v13  ;;  %vm66_vm4 = vcmp.eq.f32.partialorder %v56_v13, inf  ;;  %v69_v21 = vand.u32 2147483648, %v56_v13  ;;  %vm68_vm5 = vcmp.eq.f32.partialorder %v56_v13, 0.0 }
  0xc5   :  { %v85_v14 = vpop.eup %84 }
  0xc6   :  { %v58_v15 = vmul.f32 %v85_v14, %v55_v11 }
  0xc8   :  { %v60_v17 = vsel %vm59_vm2, %v55_v11, %v58_v15 }
  0xc9   :  { %v87_v18 = vpop.eup %86  ;;  %v63_v19 = vsel %vm61_vm3, %v62_v16, %v60_v17 }
  0xca   :  { %72 = vst.msk [vmem:[%s187_s2] sm:$0xff] %vm71_vm1, %v63_v19  ;;  %v65_v20 = vmul.f32 %v87_v18, %v56_v13 }
  0xcc   :  { %v67_v22 = vsel %vm66_vm4, %v56_v13, %v65_v20 }
  0xcd   :  { %v70_v23 = vsel %vm68_vm5, %v69_v21, %v67_v22 }
  0xce   :  { %73 = vst.msk [vmem:[%s187_s2 + $0x8] sm:$0xff] %vm71_vm1, %v70_v23 }
  0xcf   :  { %78 = vsyncpa [#allocation3], 1 }
  0xd0   :  { %79 = vsyncpa [#allocation5], 1 }

</bundles_post_ra>
